<compile_context>
chip_gen: v5e
topology: v5e:2x2
jax: 0.10.0
libtpu: 0.0.40
codegen_flags: <defaults>
</compile_context>

<pallas_src>
import math
import jax
import jax.numpy as jnp
from jax.experimental import pallas as pl
from jax.experimental.pallas import tpu as pltpu


def _make_kernel(num_heads, head_dim):
    scale = 1.0 / math.sqrt(head_dim)

    def kernel(q_ref, k_ref, v_ref,
               wq_ref, bq_ref, wk_ref, bk_ref, wv_ref, bv_ref,
               wo_ref, bo_ref, out_ref):
        Bt, Nq, E = q_ref.shape
        _, Nk, _ = k_ref.shape

        # Flatten (batch, tokens) so every projection is one dense 2-D matmul.
        q2 = q_ref[...].reshape(Bt * Nq, E)
        k2 = k_ref[...].reshape(Bt * Nk, E)
        v2 = v_ref[...].reshape(Bt * Nk, E)

        acc = jnp.zeros((Bt * Nq, E), jnp.float32)
        for h in range(num_heads):  # static unroll; per-head weights sliced host-side
            qh = jnp.dot(q2, wq_ref[h], preferred_element_type=jnp.float32) + bq_ref[h]
            kh = jnp.dot(k2, wk_ref[h], preferred_element_type=jnp.float32) + bk_ref[h]
            vh = jnp.dot(v2, wv_ref[h], preferred_element_type=jnp.float32) + bv_ref[h]

            qh3 = qh.reshape(Bt, Nq, head_dim)   # leading-dim reshapes only (cheap)
            kh3 = kh.reshape(Bt, Nk, head_dim)
            vh3 = vh.reshape(Bt, Nk, head_dim)

            s = jnp.einsum("bqd,bkd->bqk", qh3, kh3,
                           preferred_element_type=jnp.float32) * scale
            s = s - jnp.max(s, axis=-1, keepdims=True)
            p = jnp.exp(s)
            p = p * pl.reciprocal(jnp.sum(p, axis=-1, keepdims=True), approx=True)
            ho = jnp.einsum("bqk,bkd->bqd", p, vh3,
                            preferred_element_type=jnp.float32)

            # Accumulate this head's contribution of the output projection
            # (replaces concat(head_outs) @ wo — no lane concat / relayout).
            acc = acc + jnp.dot(ho.reshape(Bt * Nq, head_dim), wo_ref[h],
                                preferred_element_type=jnp.float32)

        out = acc + bo_ref[...]
        out_ref[...] = out.reshape(Bt, Nq, E)

    return kernel


def cross_attention(params, q, k, v, num_heads, block_b=None):
    B, Nq, E = q.shape
    _, Nk, _ = k.shape
    I = params["wq"].shape[1]
    assert I % num_heads == 0
    hd = I // num_heads
    if block_b is None:
        block_b = min(B, 8)   # several batch elements per grid step
    assert B % block_b == 0

    # Host-side per-head repack of weights/biases.
    wq_h = params["wq"].reshape(E, num_heads, hd).transpose(1, 0, 2)   # (nh, E, hd)
    wk_h = params["wk"].reshape(E, num_heads, hd).transpose(1, 0, 2)
    wv_h = params["wv"].reshape(E, num_heads, hd).transpose(1, 0, 2)
    bq_h = params["bq"].reshape(num_heads, 1, hd)
    bk_h = params["bk"].reshape(num_heads, 1, hd)
    bv_h = params["bv"].reshape(num_heads, 1, hd)
    wo_h = params["wo"].reshape(num_heads, hd, E)                      # (nh, hd, E)
    bo = params["bo"].reshape(1, E)

    kernel = _make_kernel(num_heads, hd)

    def full(shape):
        nd = len(shape)
        return pl.BlockSpec(shape, lambda b, _nd=nd: (0,) * _nd)

    in_specs = [
        pl.BlockSpec((block_b, Nq, E), lambda b: (b, 0, 0)),
        pl.BlockSpec((block_b, Nk, E), lambda b: (b, 0, 0)),
        pl.BlockSpec((block_b, Nk, E), lambda b: (b, 0, 0)),
        full((num_heads, E, hd)), full((num_heads, 1, hd)),
        full((num_heads, E, hd)), full((num_heads, 1, hd)),
        full((num_heads, E, hd)), full((num_heads, 1, hd)),
        full((num_heads, hd, E)), full((1, E)),
    ]
    out_specs = pl.BlockSpec((block_b, Nq, E), lambda b: (b, 0, 0))
    out_shape = jax.ShapeDtypeStruct((B, Nq, E), jnp.float32)

    flops = 2 * B * (Nq * E * I + 2 * Nk * E * I + 2 * Nq * Nk * I + Nq * I * E)
    transcendentals = B * num_heads * Nq * Nk
    bytes_accessed = 4 * (q.size + k.size + v.size + B * Nq * E
                          + 3 * E * I + 3 * I + I * E + E)

    return pl.pallas_call(
        kernel,
        out_shape=out_shape,
        grid=(B // block_b,),
        in_specs=in_specs,
        out_specs=out_specs,
        compiler_params=pltpu.CompilerParams(
            dimension_semantics=("parallel",)),
        cost_estimate=pl.CostEstimate(
            flops=flops, transcendentals=transcendentals,
            bytes_accessed=bytes_accessed),
    )(q, k, v, wq_h, bq_h, wk_h, bk_h, wv_h, bv_h, wo_h, bo)


def reference(params, q, k, v, num_heads):
    """Pure-JAX mirror of the PyTorch CrossAttention.forward."""
    qa = q @ params["wq"] + params["bq"]
    ka = k @ params["wk"] + params["bk"]
    va = v @ params["wv"] + params["bv"]
    B, Nq, I = qa.shape
    Nk = ka.shape[1]
    hd = I // num_heads
    qh = qa.reshape(B, Nq, num_heads, hd).transpose(0, 2, 1, 3)
    kh = ka.reshape(B, Nk, num_heads, hd).transpose(0, 2, 1, 3)
    vh = va.reshape(B, Nk, num_heads, hd).transpose(0, 2, 1, 3)
    s = jnp.einsum("bhqd,bhkd->bhqk", qh, kh) / math.sqrt(hd)
    p = jax.nn.softmax(s, axis=-1)
    o = jnp.einsum("bhqk,bhkd->bhqd", p, vh)
    o = o.transpose(0, 2, 1, 3).reshape(B, Nq, I)
    return o @ params["wo"] + params["bo"]


def make_params(key, embedding_dim, internal_dim):
    ks = jax.random.split(key, 8)
    n = lambda k, s: (0.05 * jax.random.normal(k, s)).astype(jnp.float32)
    return {
        "wq": n(ks[0], (embedding_dim, internal_dim)), "bq": n(ks[1], (internal_dim,)),
        "wk": n(ks[2], (embedding_dim, internal_dim)), "bk": n(ks[3], (internal_dim,)),
        "wv": n(ks[4], (embedding_dim, internal_dim)), "bv": n(ks[5], (internal_dim,)),
        "wo": n(ks[6], (internal_dim, embedding_dim)), "bo": n(ks[7], (embedding_dim,)),
    }


if __name__ == "__main__":
    # Small shapes: B=2, Nq=8, Nk=16, embedding_dim=32, num_heads=4, downsample=1.
    B, Nq, Nk = 2, 8, 16
    embedding_dim, num_heads, downsample = 32, 4, 1
    internal = embedding_dim // downsample

    key = jax.random.PRNGKey(0)
    kq, kk, kv, kp = jax.random.split(key, 4)
    q = jax.random.normal(kq, (B, Nq, embedding_dim), jnp.float32)
    k = jax.random.normal(kk, (B, Nk, embedding_dim), jnp.float32)
    v = jax.random.normal(kv, (B, Nk, embedding_dim), jnp.float32)
    params = make_params(kp, embedding_dim, internal)

    out = cross_attention(params, q, k, v, num_heads)
    jax.block_until_ready(out)

    ref = reference(params, q, k, v, num_heads)
    assert jnp.allclose(out, ref, atol=2e-3, rtol=2e-3), "output mismatch"

    print("KERNEL_OK")
</pallas_src>

<mosaic_0001>
module attributes {stable_mosaic.version = 11 : i64} {
  func.func @kernel(%arg0: i32, %arg1: memref<2x8x32xf32, #tpu.memory_space<vmem>>, %arg2: memref<2x16x32xf32, #tpu.memory_space<vmem>>, %arg3: memref<2x16x32xf32, #tpu.memory_space<vmem>>, %arg4: memref<4x32x8xf32, #tpu.memory_space<vmem>>, %arg5: memref<4x1x8xf32, #tpu.memory_space<vmem>>, %arg6: memref<4x32x8xf32, #tpu.memory_space<vmem>>, %arg7: memref<4x1x8xf32, #tpu.memory_space<vmem>>, %arg8: memref<4x32x8xf32, #tpu.memory_space<vmem>>, %arg9: memref<4x1x8xf32, #tpu.memory_space<vmem>>, %arg10: memref<4x8x32xf32, #tpu.memory_space<vmem>>, %arg11: memref<1x32xf32, #tpu.memory_space<vmem>>, %arg12: memref<2x8x32xf32, #tpu.memory_space<vmem>>) attributes {dimension_semantics = [#tpu.dimension_semantics<parallel>], iteration_bounds = array<i64: 1>, scalar_prefetch = 0 : i64, scratch_operands = 0 : i64, tpu.core_type = #tpu.core_type<tc>, window_params = [{transform_indices = @transform_0, window_bounds = array<i64: 2, 8, 32>}, {transform_indices = @transform_1, window_bounds = array<i64: 2, 16, 32>}, {transform_indices = @transform_2, window_bounds = array<i64: 2, 16, 32>}, {pipeline_mode = #tpu.pipeline_mode<synchronous>, transform_indices = @transform_3, window_bounds = array<i64: 4, 32, 8>}, {pipeline_mode = #tpu.pipeline_mode<synchronous>, transform_indices = @transform_4, window_bounds = array<i64: 4, 1, 8>}, {pipeline_mode = #tpu.pipeline_mode<synchronous>, transform_indices = @transform_5, window_bounds = array<i64: 4, 32, 8>}, {pipeline_mode = #tpu.pipeline_mode<synchronous>, transform_indices = @transform_6, window_bounds = array<i64: 4, 1, 8>}, {pipeline_mode = #tpu.pipeline_mode<synchronous>, transform_indices = @transform_7, window_bounds = array<i64: 4, 32, 8>}, {pipeline_mode = #tpu.pipeline_mode<synchronous>, transform_indices = @transform_8, window_bounds = array<i64: 4, 1, 8>}, {pipeline_mode = #tpu.pipeline_mode<synchronous>, transform_indices = @transform_9, window_bounds = array<i64: 4, 8, 32>}, {pipeline_mode = #tpu.pipeline_mode<synchronous>, transform_indices = @transform_10, window_bounds = array<i64: 1, 32>}, {transform_indices = @transform_11, window_bounds = array<i64: 2, 8, 32>}]} {
    %c0 = arith.constant 0 : index
    %c0_0 = arith.constant 0 : index
    %c0_1 = arith.constant 0 : index
    %0 = vector.load %arg1[%c0, %c0_0, %c0_1] : memref<2x8x32xf32, #tpu.memory_space<vmem>>, vector<2x8x32xf32>
    %1 = vector.shape_cast %0 : vector<2x8x32xf32> to vector<16x32xf32>
    %c0_2 = arith.constant 0 : index
    %c0_3 = arith.constant 0 : index
    %c0_4 = arith.constant 0 : index
    %2 = vector.load %arg2[%c0_2, %c0_3, %c0_4] : memref<2x16x32xf32, #tpu.memory_space<vmem>>, vector<2x16x32xf32>
    %3 = vector.shape_cast %2 : vector<2x16x32xf32> to vector<32x32xf32>
    %c0_5 = arith.constant 0 : index
    %c0_6 = arith.constant 0 : index
    %c0_7 = arith.constant 0 : index
    %4 = vector.load %arg3[%c0_5, %c0_6, %c0_7] : memref<2x16x32xf32, #tpu.memory_space<vmem>>, vector<2x16x32xf32>
    %5 = vector.shape_cast %4 : vector<2x16x32xf32> to vector<32x32xf32>
    %cst = arith.constant 0.000000e+00 : f32
    %6 = vector.broadcast %cst : f32 to vector<16x32xf32>
    %c0_8 = arith.constant 0 : index
    %c0_9 = arith.constant 0 : index
    %c0_10 = arith.constant 0 : index
    %7 = vector.load %arg4[%c0_8, %c0_9, %c0_10] : memref<4x32x8xf32, #tpu.memory_space<vmem>>, vector<1x32x8xf32>
    %8 = vector.shape_cast %7 : vector<1x32x8xf32> to vector<32x8xf32>
    %cst_11 = arith.constant dense<0.000000e+00> : vector<16x8xf32>
    %9 = tpu.matmul %1, %8, %cst_11 {dimension_numbers = #tpu.dot_dimension_numbers<[1], [0], [0], [1], [0, 0, 1, 1], [], []>} : vector<16x32xf32>, vector<32x8xf32>, vector<16x8xf32> -> vector<16x8xf32>
    %c0_12 = arith.constant 0 : index
    %c0_13 = arith.constant 0 : index
    %c0_14 = arith.constant 0 : index
    %10 = vector.load %arg5[%c0_12, %c0_13, %c0_14] : memref<4x1x8xf32, #tpu.memory_space<vmem>>, vector<1x1x8xf32>
    %11 = vector.shape_cast %10 : vector<1x1x8xf32> to vector<1x8xf32>
    %12 = vector.broadcast %11 : vector<1x8xf32> to vector<16x8xf32>
    %13 = arith.addf %9, %12 : vector<16x8xf32>
    %c0_15 = arith.constant 0 : index
    %c0_16 = arith.constant 0 : index
    %c0_17 = arith.constant 0 : index
    %14 = vector.load %arg6[%c0_15, %c0_16, %c0_17] : memref<4x32x8xf32, #tpu.memory_space<vmem>>, vector<1x32x8xf32>
    %15 = vector.shape_cast %14 : vector<1x32x8xf32> to vector<32x8xf32>
    %cst_18 = arith.constant dense<0.000000e+00> : vector<32x8xf32>
    %16 = tpu.matmul %3, %15, %cst_18 {dimension_numbers = #tpu.dot_dimension_numbers<[1], [0], [0], [1], [0, 0, 1, 1], [], []>} : vector<32x32xf32>, vector<32x8xf32>, vector<32x8xf32> -> vector<32x8xf32>
    %c0_19 = arith.constant 0 : index
    %c0_20 = arith.constant 0 : index
    %c0_21 = arith.constant 0 : index
    %17 = vector.load %arg7[%c0_19, %c0_20, %c0_21] : memref<4x1x8xf32, #tpu.memory_space<vmem>>, vector<1x1x8xf32>
    %18 = vector.shape_cast %17 : vector<1x1x8xf32> to vector<1x8xf32>
    %19 = vector.broadcast %18 : vector<1x8xf32> to vector<32x8xf32>
    %20 = arith.addf %16, %19 : vector<32x8xf32>
    %c0_22 = arith.constant 0 : index
    %c0_23 = arith.constant 0 : index
    %c0_24 = arith.constant 0 : index
    %21 = vector.load %arg8[%c0_22, %c0_23, %c0_24] : memref<4x32x8xf32, #tpu.memory_space<vmem>>, vector<1x32x8xf32>
    %22 = vector.shape_cast %21 : vector<1x32x8xf32> to vector<32x8xf32>
    %cst_25 = arith.constant dense<0.000000e+00> : vector<32x8xf32>
    %23 = tpu.matmul %5, %22, %cst_25 {dimension_numbers = #tpu.dot_dimension_numbers<[1], [0], [0], [1], [0, 0, 1, 1], [], []>} : vector<32x32xf32>, vector<32x8xf32>, vector<32x8xf32> -> vector<32x8xf32>
    %c0_26 = arith.constant 0 : index
    %c0_27 = arith.constant 0 : index
    %c0_28 = arith.constant 0 : index
    %24 = vector.load %arg9[%c0_26, %c0_27, %c0_28] : memref<4x1x8xf32, #tpu.memory_space<vmem>>, vector<1x1x8xf32>
    %25 = vector.shape_cast %24 : vector<1x1x8xf32> to vector<1x8xf32>
    %26 = vector.broadcast %25 : vector<1x8xf32> to vector<32x8xf32>
    %27 = arith.addf %23, %26 : vector<32x8xf32>
    %28 = vector.shape_cast %13 : vector<16x8xf32> to vector<2x8x8xf32>
    %29 = vector.shape_cast %20 : vector<32x8xf32> to vector<2x16x8xf32>
    %30 = vector.shape_cast %27 : vector<32x8xf32> to vector<2x16x8xf32>
    "tpu.trace_start"() <{level = 10 : i32, message = "bqd,bkd->bqk"}> : () -> ()
    %cst_29 = arith.constant dense<0.000000e+00> : vector<2x8x16xf32>
    %31 = tpu.matmul %28, %29, %cst_29 {dimension_numbers = #tpu.dot_dimension_numbers<[2], [2], [1], [1], [0, 0, 0, 1, 1, 1], [0], [0]>} : vector<2x8x8xf32>, vector<2x16x8xf32>, vector<2x8x16xf32> -> vector<2x8x16xf32>
    "tpu.trace_stop"() : () -> ()
    %cst_30 = arith.constant 0.353553385 : f32
    %32 = vector.broadcast %cst_30 : f32 to vector<2x8x16xf32>
    %33 = arith.mulf %31, %32 : vector<2x8x16xf32>
    %cst_31 = arith.constant dense<0xFF800000> : vector<2x8xf32>
    %34 = vector.multi_reduction <maximumf>, %33, %cst_31 [2] : vector<2x8x16xf32> to vector<2x8xf32>
    %35 = vector.shape_cast %34 : vector<2x8xf32> to vector<2x8x1xf32>
    %36 = vector.broadcast %35 : vector<2x8x1xf32> to vector<2x8x16xf32>
    %37 = arith.subf %33, %36 : vector<2x8x16xf32>
    %38 = math.exp %37 : vector<2x8x16xf32>
    %cst_32 = arith.constant dense<0.000000e+00> : vector<2x8xf32>
    %39 = vector.multi_reduction <add>, %38, %cst_32 [2] : vector<2x8x16xf32> to vector<2x8xf32>
    %40 = vector.shape_cast %39 : vector<2x8xf32> to vector<2x8x1xf32>
    %41 = tpu.reciprocal %40 {approx = true} : vector<2x8x1xf32> -> vector<2x8x1xf32>
    %42 = vector.broadcast %41 : vector<2x8x1xf32> to vector<2x8x16xf32>
    %43 = arith.mulf %38, %42 : vector<2x8x16xf32>
    "tpu.trace_start"() <{level = 10 : i32, message = "bqk,bkd->bqd"}> : () -> ()
    %cst_33 = arith.constant dense<0.000000e+00> : vector<2x8x8xf32>
    %44 = tpu.matmul %43, %30, %cst_33 {dimension_numbers = #tpu.dot_dimension_numbers<[2], [1], [1], [2], [0, 0, 0, 1, 1, 2], [0], [0]>} : vector<2x8x16xf32>, vector<2x16x8xf32>, vector<2x8x8xf32> -> vector<2x8x8xf32>
    "tpu.trace_stop"() : () -> ()
    %45 = vector.shape_cast %44 : vector<2x8x8xf32> to vector<16x8xf32>
    %c0_34 = arith.constant 0 : index
    %c0_35 = arith.constant 0 : index
    %c0_36 = arith.constant 0 : index
    %46 = vector.load %arg10[%c0_34, %c0_35, %c0_36] : memref<4x8x32xf32, #tpu.memory_space<vmem>>, vector<1x8x32xf32>
    %47 = vector.shape_cast %46 : vector<1x8x32xf32> to vector<8x32xf32>
    %cst_37 = arith.constant dense<0.000000e+00> : vector<16x32xf32>
    %48 = tpu.matmul %45, %47, %cst_37 {dimension_numbers = #tpu.dot_dimension_numbers<[1], [0], [0], [1], [0, 0, 1, 1], [], []>} : vector<16x8xf32>, vector<8x32xf32>, vector<16x32xf32> -> vector<16x32xf32>
    %49 = arith.addf %6, %48 : vector<16x32xf32>
    %c1 = arith.constant 1 : index
    %c0_38 = arith.constant 0 : index
    %c0_39 = arith.constant 0 : index
    %50 = vector.load %arg4[%c1, %c0_38, %c0_39] : memref<4x32x8xf32, #tpu.memory_space<vmem>>, vector<1x32x8xf32>
    %51 = vector.shape_cast %50 : vector<1x32x8xf32> to vector<32x8xf32>
    %cst_40 = arith.constant dense<0.000000e+00> : vector<16x8xf32>
    %52 = tpu.matmul %1, %51, %cst_40 {dimension_numbers = #tpu.dot_dimension_numbers<[1], [0], [0], [1], [0, 0, 1, 1], [], []>} : vector<16x32xf32>, vector<32x8xf32>, vector<16x8xf32> -> vector<16x8xf32>
    %c1_41 = arith.constant 1 : index
    %c0_42 = arith.constant 0 : index
    %c0_43 = arith.constant 0 : index
    %53 = vector.load %arg5[%c1_41, %c0_42, %c0_43] : memref<4x1x8xf32, #tpu.memory_space<vmem>>, vector<1x1x8xf32>
    %54 = vector.shape_cast %53 : vector<1x1x8xf32> to vector<1x8xf32>
    %55 = vector.broadcast %54 : vector<1x8xf32> to vector<16x8xf32>
    %56 = arith.addf %52, %55 : vector<16x8xf32>
    %c1_44 = arith.constant 1 : index
    %c0_45 = arith.constant 0 : index
    %c0_46 = arith.constant 0 : index
    %57 = vector.load %arg6[%c1_44, %c0_45, %c0_46] : memref<4x32x8xf32, #tpu.memory_space<vmem>>, vector<1x32x8xf32>
    %58 = vector.shape_cast %57 : vector<1x32x8xf32> to vector<32x8xf32>
    %cst_47 = arith.constant dense<0.000000e+00> : vector<32x8xf32>
    %59 = tpu.matmul %3, %58, %cst_47 {dimension_numbers = #tpu.dot_dimension_numbers<[1], [0], [0], [1], [0, 0, 1, 1], [], []>} : vector<32x32xf32>, vector<32x8xf32>, vector<32x8xf32> -> vector<32x8xf32>
    %c1_48 = arith.constant 1 : index
    %c0_49 = arith.constant 0 : index
    %c0_50 = arith.constant 0 : index
    %60 = vector.load %arg7[%c1_48, %c0_49, %c0_50] : memref<4x1x8xf32, #tpu.memory_space<vmem>>, vector<1x1x8xf32>
    %61 = vector.shape_cast %60 : vector<1x1x8xf32> to vector<1x8xf32>
    %62 = vector.broadcast %61 : vector<1x8xf32> to vector<32x8xf32>
    %63 = arith.addf %59, %62 : vector<32x8xf32>
    %c1_51 = arith.constant 1 : index
    %c0_52 = arith.constant 0 : index
    %c0_53 = arith.constant 0 : index
    %64 = vector.load %arg8[%c1_51, %c0_52, %c0_53] : memref<4x32x8xf32, #tpu.memory_space<vmem>>, vector<1x32x8xf32>
    %65 = vector.shape_cast %64 : vector<1x32x8xf32> to vector<32x8xf32>
    %cst_54 = arith.constant dense<0.000000e+00> : vector<32x8xf32>
    %66 = tpu.matmul %5, %65, %cst_54 {dimension_numbers = #tpu.dot_dimension_numbers<[1], [0], [0], [1], [0, 0, 1, 1], [], []>} : vector<32x32xf32>, vector<32x8xf32>, vector<32x8xf32> -> vector<32x8xf32>
    %c1_55 = arith.constant 1 : index
    %c0_56 = arith.constant 0 : index
    %c0_57 = arith.constant 0 : index
    %67 = vector.load %arg9[%c1_55, %c0_56, %c0_57] : memref<4x1x8xf32, #tpu.memory_space<vmem>>, vector<1x1x8xf32>
    %68 = vector.shape_cast %67 : vector<1x1x8xf32> to vector<1x8xf32>
    %69 = vector.broadcast %68 : vector<1x8xf32> to vector<32x8xf32>
    %70 = arith.addf %66, %69 : vector<32x8xf32>
    %71 = vector.shape_cast %56 : vector<16x8xf32> to vector<2x8x8xf32>
    %72 = vector.shape_cast %63 : vector<32x8xf32> to vector<2x16x8xf32>
    %73 = vector.shape_cast %70 : vector<32x8xf32> to vector<2x16x8xf32>
    "tpu.trace_start"() <{level = 10 : i32, message = "bqd,bkd->bqk"}> : () -> ()
    %cst_58 = arith.constant dense<0.000000e+00> : vector<2x8x16xf32>
    %74 = tpu.matmul %71, %72, %cst_58 {dimension_numbers = #tpu.dot_dimension_numbers<[2], [2], [1], [1], [0, 0, 0, 1, 1, 1], [0], [0]>} : vector<2x8x8xf32>, vector<2x16x8xf32>, vector<2x8x16xf32> -> vector<2x8x16xf32>
    "tpu.trace_stop"() : () -> ()
    %cst_59 = arith.constant 0.353553385 : f32
    %75 = vector.broadcast %cst_59 : f32 to vector<2x8x16xf32>
    %76 = arith.mulf %74, %75 : vector<2x8x16xf32>
    %cst_60 = arith.constant dense<0xFF800000> : vector<2x8xf32>
    %77 = vector.multi_reduction <maximumf>, %76, %cst_60 [2] : vector<2x8x16xf32> to vector<2x8xf32>
    %78 = vector.shape_cast %77 : vector<2x8xf32> to vector<2x8x1xf32>
    %79 = vector.broadcast %78 : vector<2x8x1xf32> to vector<2x8x16xf32>
    %80 = arith.subf %76, %79 : vector<2x8x16xf32>
    %81 = math.exp %80 : vector<2x8x16xf32>
    %cst_61 = arith.constant dense<0.000000e+00> : vector<2x8xf32>
    %82 = vector.multi_reduction <add>, %81, %cst_61 [2] : vector<2x8x16xf32> to vector<2x8xf32>
    %83 = vector.shape_cast %82 : vector<2x8xf32> to vector<2x8x1xf32>
    %84 = tpu.reciprocal %83 {approx = true} : vector<2x8x1xf32> -> vector<2x8x1xf32>
    %85 = vector.broadcast %84 : vector<2x8x1xf32> to vector<2x8x16xf32>
    %86 = arith.mulf %81, %85 : vector<2x8x16xf32>
    "tpu.trace_start"() <{level = 10 : i32, message = "bqk,bkd->bqd"}> : () -> ()
    %cst_62 = arith.constant dense<0.000000e+00> : vector<2x8x8xf32>
    %87 = tpu.matmul %86, %73, %cst_62 {dimension_numbers = #tpu.dot_dimension_numbers<[2], [1], [1], [2], [0, 0, 0, 1, 1, 2], [0], [0]>} : vector<2x8x16xf32>, vector<2x16x8xf32>, vector<2x8x8xf32> -> vector<2x8x8xf32>
    "tpu.trace_stop"() : () -> ()
    %88 = vector.shape_cast %87 : vector<2x8x8xf32> to vector<16x8xf32>
    %c1_63 = arith.constant 1 : index
    %c0_64 = arith.constant 0 : index
    %c0_65 = arith.constant 0 : index
    %89 = vector.load %arg10[%c1_63, %c0_64, %c0_65] : memref<4x8x32xf32, #tpu.memory_space<vmem>>, vector<1x8x32xf32>
    %90 = vector.shape_cast %89 : vector<1x8x32xf32> to vector<8x32xf32>
    %cst_66 = arith.constant dense<0.000000e+00> : vector<16x32xf32>
    %91 = tpu.matmul %88, %90, %cst_66 {dimension_numbers = #tpu.dot_dimension_numbers<[1], [0], [0], [1], [0, 0, 1, 1], [], []>} : vector<16x8xf32>, vector<8x32xf32>, vector<16x32xf32> -> vector<16x32xf32>
    %92 = arith.addf %49, %91 : vector<16x32xf32>
    %c2 = arith.constant 2 : index
    %c0_67 = arith.constant 0 : index
    %c0_68 = arith.constant 0 : index
    %93 = vector.load %arg4[%c2, %c0_67, %c0_68] : memref<4x32x8xf32, #tpu.memory_space<vmem>>, vector<1x32x8xf32>
    %94 = vector.shape_cast %93 : vector<1x32x8xf32> to vector<32x8xf32>
    %cst_69 = arith.constant dense<0.000000e+00> : vector<16x8xf32>
    %95 = tpu.matmul %1, %94, %cst_69 {dimension_numbers = #tpu.dot_dimension_numbers<[1], [0], [0], [1], [0, 0, 1, 1], [], []>} : vector<16x32xf32>, vector<32x8xf32>, vector<16x8xf32> -> vector<16x8xf32>
    %c2_70 = arith.constant 2 : index
    %c0_71 = arith.constant 0 : index
    %c0_72 = arith.constant 0 : index
    %96 = vector.load %arg5[%c2_70, %c0_71, %c0_72] : memref<4x1x8xf32, #tpu.memory_space<vmem>>, vector<1x1x8xf32>
    %97 = vector.shape_cast %96 : vector<1x1x8xf32> to vector<1x8xf32>
    %98 = vector.broadcast %97 : vector<1x8xf32> to vector<16x8xf32>
    %99 = arith.addf %95, %98 : vector<16x8xf32>
    %c2_73 = arith.constant 2 : index
    %c0_74 = arith.constant 0 : index
    %c0_75 = arith.constant 0 : index
    %100 = vector.load %arg6[%c2_73, %c0_74, %c0_75] : memref<4x32x8xf32, #tpu.memory_space<vmem>>, vector<1x32x8xf32>
    %101 = vector.shape_cast %100 : vector<1x32x8xf32> to vector<32x8xf32>
    %cst_76 = arith.constant dense<0.000000e+00> : vector<32x8xf32>
    %102 = tpu.matmul %3, %101, %cst_76 {dimension_numbers = #tpu.dot_dimension_numbers<[1], [0], [0], [1], [0, 0, 1, 1], [], []>} : vector<32x32xf32>, vector<32x8xf32>, vector<32x8xf32> -> vector<32x8xf32>
    %c2_77 = arith.constant 2 : index
    %c0_78 = arith.constant 0 : index
    %c0_79 = arith.constant 0 : index
    %103 = vector.load %arg7[%c2_77, %c0_78, %c0_79] : memref<4x1x8xf32, #tpu.memory_space<vmem>>, vector<1x1x8xf32>
    %104 = vector.shape_cast %103 : vector<1x1x8xf32> to vector<1x8xf32>
    %105 = vector.broadcast %104 : vector<1x8xf32> to vector<32x8xf32>
    %106 = arith.addf %102, %105 : vector<32x8xf32>
    %c2_80 = arith.constant 2 : index
    %c0_81 = arith.constant 0 : index
    %c0_82 = arith.constant 0 : index
    %107 = vector.load %arg8[%c2_80, %c0_81, %c0_82] : memref<4x32x8xf32, #tpu.memory_space<vmem>>, vector<1x32x8xf32>
    %108 = vector.shape_cast %107 : vector<1x32x8xf32> to vector<32x8xf32>
    %cst_83 = arith.constant dense<0.000000e+00> : vector<32x8xf32>
    %109 = tpu.matmul %5, %108, %cst_83 {dimension_numbers = #tpu.dot_dimension_numbers<[1], [0], [0], [1], [0, 0, 1, 1], [], []>} : vector<32x32xf32>, vector<32x8xf32>, vector<32x8xf32> -> vector<32x8xf32>
    %c2_84 = arith.constant 2 : index
    %c0_85 = arith.constant 0 : index
    %c0_86 = arith.constant 0 : index
    %110 = vector.load %arg9[%c2_84, %c0_85, %c0_86] : memref<4x1x8xf32, #tpu.memory_space<vmem>>, vector<1x1x8xf32>
    %111 = vector.shape_cast %110 : vector<1x1x8xf32> to vector<1x8xf32>
    %112 = vector.broadcast %111 : vector<1x8xf32> to vector<32x8xf32>
    %113 = arith.addf %109, %112 : vector<32x8xf32>
    %114 = vector.shape_cast %99 : vector<16x8xf32> to vector<2x8x8xf32>
    %115 = vector.shape_cast %106 : vector<32x8xf32> to vector<2x16x8xf32>
    %116 = vector.shape_cast %113 : vector<32x8xf32> to vector<2x16x8xf32>
    "tpu.trace_start"() <{level = 10 : i32, message = "bqd,bkd->bqk"}> : () -> ()
    %cst_87 = arith.constant dense<0.000000e+00> : vector<2x8x16xf32>
    %117 = tpu.matmul %114, %115, %cst_87 {dimension_numbers = #tpu.dot_dimension_numbers<[2], [2], [1], [1], [0, 0, 0, 1, 1, 1], [0], [0]>} : vector<2x8x8xf32>, vector<2x16x8xf32>, vector<2x8x16xf32> -> vector<2x8x16xf32>
    "tpu.trace_stop"() : () -> ()
    %cst_88 = arith.constant 0.353553385 : f32
    %118 = vector.broadcast %cst_88 : f32 to vector<2x8x16xf32>
    %119 = arith.mulf %117, %118 : vector<2x8x16xf32>
    %cst_89 = arith.constant dense<0xFF800000> : vector<2x8xf32>
    %120 = vector.multi_reduction <maximumf>, %119, %cst_89 [2] : vector<2x8x16xf32> to vector<2x8xf32>
    %121 = vector.shape_cast %120 : vector<2x8xf32> to vector<2x8x1xf32>
    %122 = vector.broadcast %121 : vector<2x8x1xf32> to vector<2x8x16xf32>
    %123 = arith.subf %119, %122 : vector<2x8x16xf32>
    %124 = math.exp %123 : vector<2x8x16xf32>
    %cst_90 = arith.constant dense<0.000000e+00> : vector<2x8xf32>
    %125 = vector.multi_reduction <add>, %124, %cst_90 [2] : vector<2x8x16xf32> to vector<2x8xf32>
    %126 = vector.shape_cast %125 : vector<2x8xf32> to vector<2x8x1xf32>
    %127 = tpu.reciprocal %126 {approx = true} : vector<2x8x1xf32> -> vector<2x8x1xf32>
    %128 = vector.broadcast %127 : vector<2x8x1xf32> to vector<2x8x16xf32>
    %129 = arith.mulf %124, %128 : vector<2x8x16xf32>
    "tpu.trace_start"() <{level = 10 : i32, message = "bqk,bkd->bqd"}> : () -> ()
    %cst_91 = arith.constant dense<0.000000e+00> : vector<2x8x8xf32>
    %130 = tpu.matmul %129, %116, %cst_91 {dimension_numbers = #tpu.dot_dimension_numbers<[2], [1], [1], [2], [0, 0, 0, 1, 1, 2], [0], [0]>} : vector<2x8x16xf32>, vector<2x16x8xf32>, vector<2x8x8xf32> -> vector<2x8x8xf32>
    "tpu.trace_stop"() : () -> ()
    %131 = vector.shape_cast %130 : vector<2x8x8xf32> to vector<16x8xf32>
    %c2_92 = arith.constant 2 : index
    %c0_93 = arith.constant 0 : index
    %c0_94 = arith.constant 0 : index
    %132 = vector.load %arg10[%c2_92, %c0_93, %c0_94] : memref<4x8x32xf32, #tpu.memory_space<vmem>>, vector<1x8x32xf32>
    %133 = vector.shape_cast %132 : vector<1x8x32xf32> to vector<8x32xf32>
    %cst_95 = arith.constant dense<0.000000e+00> : vector<16x32xf32>
    %134 = tpu.matmul %131, %133, %cst_95 {dimension_numbers = #tpu.dot_dimension_numbers<[1], [0], [0], [1], [0, 0, 1, 1], [], []>} : vector<16x8xf32>, vector<8x32xf32>, vector<16x32xf32> -> vector<16x32xf32>
    %135 = arith.addf %92, %134 : vector<16x32xf32>
    %c3 = arith.constant 3 : index
    %c0_96 = arith.constant 0 : index
    %c0_97 = arith.constant 0 : index
    %136 = vector.load %arg4[%c3, %c0_96, %c0_97] : memref<4x32x8xf32, #tpu.memory_space<vmem>>, vector<1x32x8xf32>
    %137 = vector.shape_cast %136 : vector<1x32x8xf32> to vector<32x8xf32>
    %cst_98 = arith.constant dense<0.000000e+00> : vector<16x8xf32>
    %138 = tpu.matmul %1, %137, %cst_98 {dimension_numbers = #tpu.dot_dimension_numbers<[1], [0], [0], [1], [0, 0, 1, 1], [], []>} : vector<16x32xf32>, vector<32x8xf32>, vector<16x8xf32> -> vector<16x8xf32>
    %c3_99 = arith.constant 3 : index
    %c0_100 = arith.constant 0 : index
    %c0_101 = arith.constant 0 : index
    %139 = vector.load %arg5[%c3_99, %c0_100, %c0_101] : memref<4x1x8xf32, #tpu.memory_space<vmem>>, vector<1x1x8xf32>
    %140 = vector.shape_cast %139 : vector<1x1x8xf32> to vector<1x8xf32>
    %141 = vector.broadcast %140 : vector<1x8xf32> to vector<16x8xf32>
    %142 = arith.addf %138, %141 : vector<16x8xf32>
    %c3_102 = arith.constant 3 : index
    %c0_103 = arith.constant 0 : index
    %c0_104 = arith.constant 0 : index
    %143 = vector.load %arg6[%c3_102, %c0_103, %c0_104] : memref<4x32x8xf32, #tpu.memory_space<vmem>>, vector<1x32x8xf32>
    %144 = vector.shape_cast %143 : vector<1x32x8xf32> to vector<32x8xf32>
    %cst_105 = arith.constant dense<0.000000e+00> : vector<32x8xf32>
    %145 = tpu.matmul %3, %144, %cst_105 {dimension_numbers = #tpu.dot_dimension_numbers<[1], [0], [0], [1], [0, 0, 1, 1], [], []>} : vector<32x32xf32>, vector<32x8xf32>, vector<32x8xf32> -> vector<32x8xf32>
    %c3_106 = arith.constant 3 : index
    %c0_107 = arith.constant 0 : index
    %c0_108 = arith.constant 0 : index
    %146 = vector.load %arg7[%c3_106, %c0_107, %c0_108] : memref<4x1x8xf32, #tpu.memory_space<vmem>>, vector<1x1x8xf32>
    %147 = vector.shape_cast %146 : vector<1x1x8xf32> to vector<1x8xf32>
    %148 = vector.broadcast %147 : vector<1x8xf32> to vector<32x8xf32>
    %149 = arith.addf %145, %148 : vector<32x8xf32>
    %c3_109 = arith.constant 3 : index
    %c0_110 = arith.constant 0 : index
    %c0_111 = arith.constant 0 : index
    %150 = vector.load %arg8[%c3_109, %c0_110, %c0_111] : memref<4x32x8xf32, #tpu.memory_space<vmem>>, vector<1x32x8xf32>
    %151 = vector.shape_cast %150 : vector<1x32x8xf32> to vector<32x8xf32>
    %cst_112 = arith.constant dense<0.000000e+00> : vector<32x8xf32>
    %152 = tpu.matmul %5, %151, %cst_112 {dimension_numbers = #tpu.dot_dimension_numbers<[1], [0], [0], [1], [0, 0, 1, 1], [], []>} : vector<32x32xf32>, vector<32x8xf32>, vector<32x8xf32> -> vector<32x8xf32>
    %c3_113 = arith.constant 3 : index
    %c0_114 = arith.constant 0 : index
    %c0_115 = arith.constant 0 : index
    %153 = vector.load %arg9[%c3_113, %c0_114, %c0_115] : memref<4x1x8xf32, #tpu.memory_space<vmem>>, vector<1x1x8xf32>
    %154 = vector.shape_cast %153 : vector<1x1x8xf32> to vector<1x8xf32>
    %155 = vector.broadcast %154 : vector<1x8xf32> to vector<32x8xf32>
    %156 = arith.addf %152, %155 : vector<32x8xf32>
    %157 = vector.shape_cast %142 : vector<16x8xf32> to vector<2x8x8xf32>
    %158 = vector.shape_cast %149 : vector<32x8xf32> to vector<2x16x8xf32>
    %159 = vector.shape_cast %156 : vector<32x8xf32> to vector<2x16x8xf32>
    "tpu.trace_start"() <{level = 10 : i32, message = "bqd,bkd->bqk"}> : () -> ()
    %cst_116 = arith.constant dense<0.000000e+00> : vector<2x8x16xf32>
    %160 = tpu.matmul %157, %158, %cst_116 {dimension_numbers = #tpu.dot_dimension_numbers<[2], [2], [1], [1], [0, 0, 0, 1, 1, 1], [0], [0]>} : vector<2x8x8xf32>, vector<2x16x8xf32>, vector<2x8x16xf32> -> vector<2x8x16xf32>
    "tpu.trace_stop"() : () -> ()
    %cst_117 = arith.constant 0.353553385 : f32
    %161 = vector.broadcast %cst_117 : f32 to vector<2x8x16xf32>
    %162 = arith.mulf %160, %161 : vector<2x8x16xf32>
    %cst_118 = arith.constant dense<0xFF800000> : vector<2x8xf32>
    %163 = vector.multi_reduction <maximumf>, %162, %cst_118 [2] : vector<2x8x16xf32> to vector<2x8xf32>
    %164 = vector.shape_cast %163 : vector<2x8xf32> to vector<2x8x1xf32>
    %165 = vector.broadcast %164 : vector<2x8x1xf32> to vector<2x8x16xf32>
    %166 = arith.subf %162, %165 : vector<2x8x16xf32>
    %167 = math.exp %166 : vector<2x8x16xf32>
    %cst_119 = arith.constant dense<0.000000e+00> : vector<2x8xf32>
    %168 = vector.multi_reduction <add>, %167, %cst_119 [2] : vector<2x8x16xf32> to vector<2x8xf32>
    %169 = vector.shape_cast %168 : vector<2x8xf32> to vector<2x8x1xf32>
    %170 = tpu.reciprocal %169 {approx = true} : vector<2x8x1xf32> -> vector<2x8x1xf32>
    %171 = vector.broadcast %170 : vector<2x8x1xf32> to vector<2x8x16xf32>
    %172 = arith.mulf %167, %171 : vector<2x8x16xf32>
    "tpu.trace_start"() <{level = 10 : i32, message = "bqk,bkd->bqd"}> : () -> ()
    %cst_120 = arith.constant dense<0.000000e+00> : vector<2x8x8xf32>
    %173 = tpu.matmul %172, %159, %cst_120 {dimension_numbers = #tpu.dot_dimension_numbers<[2], [1], [1], [2], [0, 0, 0, 1, 1, 2], [0], [0]>} : vector<2x8x16xf32>, vector<2x16x8xf32>, vector<2x8x8xf32> -> vector<2x8x8xf32>
    "tpu.trace_stop"() : () -> ()
    %174 = vector.shape_cast %173 : vector<2x8x8xf32> to vector<16x8xf32>
    %c3_121 = arith.constant 3 : index
    %c0_122 = arith.constant 0 : index
    %c0_123 = arith.constant 0 : index
    %175 = vector.load %arg10[%c3_121, %c0_122, %c0_123] : memref<4x8x32xf32, #tpu.memory_space<vmem>>, vector<1x8x32xf32>
    %176 = vector.shape_cast %175 : vector<1x8x32xf32> to vector<8x32xf32>
    %cst_124 = arith.constant dense<0.000000e+00> : vector<16x32xf32>
    %177 = tpu.matmul %174, %176, %cst_124 {dimension_numbers = #tpu.dot_dimension_numbers<[1], [0], [0], [1], [0, 0, 1, 1], [], []>} : vector<16x8xf32>, vector<8x32xf32>, vector<16x32xf32> -> vector<16x32xf32>
    %178 = arith.addf %135, %177 : vector<16x32xf32>
    %c0_125 = arith.constant 0 : index
    %c0_126 = arith.constant 0 : index
    %179 = vector.load %arg11[%c0_125, %c0_126] : memref<1x32xf32, #tpu.memory_space<vmem>>, vector<1x32xf32>
    %180 = vector.broadcast %179 : vector<1x32xf32> to vector<16x32xf32>
    %181 = arith.addf %178, %180 : vector<16x32xf32>
    %182 = vector.shape_cast %181 : vector<16x32xf32> to vector<2x8x32xf32>
    %c0_127 = arith.constant 0 : index
    %c0_128 = arith.constant 0 : index
    %c0_129 = arith.constant 0 : index
    %183 = vector.load %arg12[%c0_127, %c0_128, %c0_129] : memref<2x8x32xf32, #tpu.memory_space<vmem>>, vector<2x8x32xf32>
    tpu.vector_store %arg12[%c0_127, %c0_128, %c0_129], %182 {strides = array<i32>} : memref<2x8x32xf32, #tpu.memory_space<vmem>>, vector<2x8x32xf32>,
    return
  }
  func.func @transform_0(%arg0: i32) -> (i32, i32, i32) {
    %c0_i32 = arith.constant 0 : i32
    %c0_i32_0 = arith.constant 0 : i32
    %c0_i32_1 = arith.constant 0 : i32
    return %arg0, %c0_i32, %c0_i32_0 : i32, i32, i32
  }
  func.func @transform_1(%arg0: i32) -> (i32, i32, i32) {
    %c0_i32 = arith.constant 0 : i32
    %c0_i32_0 = arith.constant 0 : i32
    %c0_i32_1 = arith.constant 0 : i32
    return %arg0, %c0_i32, %c0_i32_0 : i32, i32, i32
  }
  func.func @transform_2(%arg0: i32) -> (i32, i32, i32) {
    %c0_i32 = arith.constant 0 : i32
    %c0_i32_0 = arith.constant 0 : i32
    %c0_i32_1 = arith.constant 0 : i32
    return %arg0, %c0_i32, %c0_i32_0 : i32, i32, i32
  }
  func.func @transform_3(%arg0: i32) -> (i32, i32, i32) {
    %c0_i32 = arith.constant 0 : i32
    %c0_i32_0 = arith.constant 0 : i32
    %c0_i32_1 = arith.constant 0 : i32
    %c0_i32_2 = arith.constant 0 : i32
    return %c0_i32, %c0_i32_0, %c0_i32_1 : i32, i32, i32
  }
  func.func @transform_4(%arg0: i32) -> (i32, i32, i32) {
    %c0_i32 = arith.constant 0 : i32
    %c0_i32_0 = arith.constant 0 : i32
    %c0_i32_1 = arith.constant 0 : i32
    %c0_i32_2 = arith.constant 0 : i32
    return %c0_i32, %c0_i32_0, %c0_i32_1 : i32, i32, i32
  }
  func.func @transform_5(%arg0: i32) -> (i32, i32, i32) {
    %c0_i32 = arith.constant 0 : i32
    %c0_i32_0 = arith.constant 0 : i32
    %c0_i32_1 = arith.constant 0 : i32
    %c0_i32_2 = arith.constant 0 : i32
    return %c0_i32, %c0_i32_0, %c0_i32_1 : i32, i32, i32
  }
  func.func @transform_6(%arg0: i32) -> (i32, i32, i32) {
    %c0_i32 = arith.constant 0 : i32
    %c0_i32_0 = arith.constant 0 : i32
    %c0_i32_1 = arith.constant 0 : i32
    %c0_i32_2 = arith.constant 0 : i32
    return %c0_i32, %c0_i32_0, %c0_i32_1 : i32, i32, i32
  }
  func.func @transform_7(%arg0: i32) -> (i32, i32, i32) {
    %c0_i32 = arith.constant 0 : i32
    %c0_i32_0 = arith.constant 0 : i32
    %c0_i32_1 = arith.constant 0 : i32
    %c0_i32_2 = arith.constant 0 : i32
    return %c0_i32, %c0_i32_0, %c0_i32_1 : i32, i32, i32
  }
  func.func @transform_8(%arg0: i32) -> (i32, i32, i32) {
    %c0_i32 = arith.constant 0 : i32
    %c0_i32_0 = arith.constant 0 : i32
    %c0_i32_1 = arith.constant 0 : i32
    %c0_i32_2 = arith.constant 0 : i32
    return %c0_i32, %c0_i32_0, %c0_i32_1 : i32, i32, i32
  }
  func.func @transform_9(%arg0: i32) -> (i32, i32, i32) {
    %c0_i32 = arith.constant 0 : i32
    %c0_i32_0 = arith.constant 0 : i32
    %c0_i32_1 = arith.constant 0 : i32
    %c0_i32_2 = arith.constant 0 : i32
    return %c0_i32, %c0_i32_0, %c0_i32_1 : i32, i32, i32
  }
  func.func @transform_10(%arg0: i32) -> (i32, i32) {
    %c0_i32 = arith.constant 0 : i32
    %c0_i32_0 = arith.constant 0 : i32
    %c0_i32_1 = arith.constant 0 : i32
    return %c0_i32, %c0_i32_0 : i32, i32
  }
  func.func @transform_11(%arg0: i32) -> (i32, i32, i32) {
    %c0_i32 = arith.constant 0 : i32
    %c0_i32_0 = arith.constant 0 : i32
    %c0_i32_1 = arith.constant 0 : i32
    return %arg0, %c0_i32, %c0_i32_0 : i32, i32, i32
  }
}

</mosaic_0001>

<bundles_post_ra>
// kernel: tpu_custom_call.1
= control target key start
LH: loop header
LB: loop body
LE: loop exit
PB: predicated region body
PF: predicated region fallthrough
CT: control target
= control target key end

     0   :  { %vm57_vm0 = vcmask 261120   ;;  %s1862_s0 = inlined_call_operand.vmem [shape: f32[2,8,32], index: 0, kind: input, shape index: {}]   ;;  %s1863_s1 = inlined_call_operand.vmem [shape: f32[2,16,32], index: 1, kind: input, shape index: {}]   ;;  %s1864_s2 = inlined_call_operand.vmem [shape: f32[2,16,32], index: 2, kind: input, shape index: {}]   ;;  %s1865_s3 = inlined_call_operand.vmem [shape: f32[4,32,8], index: 3, kind: input, shape index: {}]   ;;  %s1866_s4 = inlined_call_operand.vmem [shape: f32[4,1,8], index: 4, kind: input, shape index: {}]   ;;  %s1867_s5 = inlined_call_operand.vmem [shape: f32[4,32,8], index: 5, kind: input, shape index: {}]   ;;  %s1868_s6 = inlined_call_operand.vmem [shape: f32[4,1,8], index: 6, kind: input, shape index: {}]   ;;  %s1869_s7 = inlined_call_operand.vmem [shape: f32[4,32,8], index: 7, kind: input, shape index: {}]   ;;  %s1870_s8 = inlined_call_operand.vmem [shape: f32[4,1,8], index: 8, kind: input, shape index: {}]   ;;  %s1871_s9 = inlined_call_operand.vmem [shape: f32[4,8,32], index: 9, kind: input, shape index: {}]   ;;  %s1872_s10 = inlined_call_operand.vmem [shape: f32[1,32], index: 10, kind: input, shape index: {}]   ;;  %s1873_s11 = inlined_call_operand.hbm [shape: f32[2,8,32], index: 11, kind: output, shape index: {}]  }
   0x1   :  { %v90_v0 = vld [vmem:[%s1867_s5 + $0x18] sm:$0xff]  ;;  %v89_v1 = vld [vmem:[%s1867_s5 + $0x10] sm:$0xff]  ;;  %v88_v2 = vld [vmem:[%s1867_s5 + $0x8] sm:$0xff] }
   0x2   :  { %119 = vmatpush.msra.mxu1 %v90_v0  ;;  %v52_v3 = vld [vmem:[%s1865_s3 + $0x18] sm:$0xff]  ;;  %v51_v4 = vld [vmem:[%s1865_s3 + $0x10] sm:$0xff]  ;;  %v87_v5 = vld [vmem:[%s1867_s5] sm:$0xff] }
   0x3   :  { %v1475_v6 = vld [vmem:[%s1863_s1] sm:$0xff]  ;;  %76 = vmatpush.msra.mxu0 %v52_v3  ;;  %1313 = vmatpush.msra.mxu3 %v52_v3  ;;  %v50_v7 = vld [vmem:[%s1865_s3 + $0x8] sm:$0xff] }
   0x4   :  { %120 = vmatpush.msra.mxu1 %v89_v1  ;;  %v49_v8 = vld [vmem:[%s1865_s3] sm:$0xff]  ;;  %v1491_v10 = vld [vmem:[%s1862_s0 + $0x8] sm:$0xff] }
   0x5   :  { %77 = vmatpush.msra.mxu0 %v51_v4  ;;  %v1486_v9 = vld [vmem:[%s1862_s0] sm:$0xff]  ;;  %1314 = vmatpush.msra.mxu3 %v51_v4 }
   0x6   :  { %121 = vmatpush.msra.mxu1 %v88_v2 }
   0x7   :  { %78 = vmatpush.msra.mxu0 %v50_v7  ;;  %1315 = vmatpush.msra.mxu3 %v50_v7 }
   0x8   :  { %122 = vmatpush.msra.mxu1 %v87_v5 }
   0x9   :  { %1187 = vmatmul.msk.f32.vlgmr.msra.gmra.mxu1 %vm57_vm0, %v1475_v6  ;;  %79 = vmatpush.msra.mxu0 %v49_v8 }
   0xa   :  { %16 = vsyncpa [#allocation3], 0  ;;  %1185 = vmatmul.msk.f32.vlgmr.msra.gmra.mxu0 %vm57_vm0, %v1486_v9  ;;  %1316 = vmatpush.msra.mxu3 %v49_v8  ;;  %v1502_v11 = vld [vmem:[%s1863_s1 + $0x8] sm:$0xff]  ;;  %v1509_v12 = vld [vmem:[%s1863_s1 + $0x10] sm:$0xff]  ;;  %vm185_vm1 = vcmask 64512   ;;  %vm246_vm2 = vcmask 130048  }
   0xb   :  { %1186 = vmatmul.msk.f32.vlgmr.msra.gmra.mxu3 %vm57_vm0, %v1491_v10  ;;  %v1516_v13 = vld [vmem:[%s1863_s1 + $0x18] sm:$0xff]  ;;  %v1320_v15 = vld [vmem:[%s1868_s6] ss:$0 sm:$0xff]  ;;  %v138_v29 = vld [vmem:[%s1869_s7 + $0x10] sm:$0xff]  ;;  %s1391_s29 = smov [#allocation2]   ;;  %s1173_s13 = sshll.u32 %s1873_s11, 4  ;;  %s1174_s13 = int_to_ptr.hbm [resolvable:$true] %s1173_s13 }
   0xc   :  { %v1321_v18 = vld [vmem:[%s1866_s4] ss:$0 sm:$0xff]  ;;  %v139_v28 = vld [vmem:[%s1869_s7 + $0x18] sm:$0xff]  ;;  %v137_v30 = vld [vmem:[%s1869_s7 + $0x8] sm:$0xff]  ;;  %s1171_s30 = sshll.u32 %s1391_s29, 4  ;;  %s1392_s14 = smov 128   ;;  %s1172_s30 = int_to_ptr.vmem [resolvable:$true] %s1171_s30 }
   0xd   :  { %168 = vmatpush.msra.mxu2 %v139_v28  ;;  %v136_v31 = vld [vmem:[%s1869_s7] sm:$0xff]  ;;  %v1554_v34 = vld [vmem:[%s1864_s2 + $0x8] sm:$0xff]  ;;  %v1561_v37 = vld [vmem:[%s1864_s2 + $0x10] sm:$0xff] }
   0xe   :  { %v1547_v32 = vld [vmem:[%s1864_s2] sm:$0xff]  ;;  %v1569_v40 = vld [vmem:[%s1864_s2 + $0x18] sm:$0xff]  ;;  %v1212_v62 = vld [vmem:[%s1867_s5 + $0x30] sm:$0xff] }
   0xf   :  { %169 = vmatpush.msra.mxu2 %v138_v29  ;;  %v1322_v46 = vld [vmem:[%s1870_s8] ss:$0 sm:$0xff]  ;;  %v1213_v61 = vld [vmem:[%s1867_s5 + $0x38] sm:$0xff]  ;;  %v1211_v63 = vld [vmem:[%s1867_s5 + $0x28] sm:$0xff] }
  0x10   :  { %v1210_v0 = vld [vmem:[%s1867_s5 + $0x20] sm:$0xff]  ;;  %v1206_v1 = vld [vmem:[%s1865_s3 + $0x38] sm:$0xff]  ;;  %v1205_v2 = vld [vmem:[%s1865_s3 + $0x30] sm:$0xff] }
  0x11   :  { %1188 = vmatmul.msk.f32.gmra.mxu1 %vm57_vm0, %v1502_v11  ;;  %170 = vmatpush.msra.mxu2 %v137_v30  ;;  %v1204_v4 = vld [vmem:[%s1865_s3 + $0x28] sm:$0xff]  ;;  %v1203_v5 = vld [vmem:[%s1865_s3 + $0x20] sm:$0xff]  ;;  %v1243_v28 = vld [vmem:[%s1865_s3 + $0x50] sm:$0xff] }
  0x12   :  { %v1242_v29 = vld [vmem:[%s1865_s3 + $0x48] sm:$0xff] }
  0x13   :  { %171 = vmatpush.msra.mxu2 %v136_v31  ;;  %v1241_v31 = vld [vmem:[%s1865_s3 + $0x40] sm:$0xff] }
  0x14   :  { %1191 = vmatmul.msk.f32.vlgmr.msra.gmra.mxu2 %vm57_vm0, %v1547_v32 }
  0x19   :  { %1189 = vmatmul.msk.f32.gmra.mxu1 %vm57_vm0, %v1509_v12 }
  0x1c   :  { %1192 = vmatmul.msk.f32.gmra.mxu2 %vm57_vm0, %v1554_v34 }
  0x21   :  { %1190 = vmatmul.msk.f32.gmra.mxu1 %vm57_vm0, %v1516_v13 }
  0x24   :  { %1193 = vmatmul.msk.f32.gmra.mxu2 %vm57_vm0, %v1561_v37 }
  0x2c   :  { %1194 = vmatmul.msk.f32.gmra.mxu2 %vm57_vm0, %v1569_v40 }
  0x86   :  { %v124_v14 = vpop.f32.mrf.mxu1 }
  0x87   :  { %v81_v19 = vpop.f32.mrf.mxu0  ;;  %v125_v20 = vadd.f32 %v1320_v15, %v124_v14 }
  0x88   :  { %v82_v21 = vadd.f32 %v1321_v18, %v81_v19  ;;  %v1220_v19 = vld [vmem:[%s1869_s7 + $0x28] sm:$0xff] }
  0x8e   :  { %v127_v16 = vpop.f32.mrf.mxu1  ;;  %v84_v25 = vpop.f32.mrf.mxu3 }
  0x8f   :  { %v128_v17 = vadd.f32 %v1320_v15, %v127_v16  ;;  %v85_v27 = vadd.f32 %v1321_v18, %v84_v25  ;;  %v1221_v18 = vld [vmem:[%s1869_s7 + $0x30] sm:$0xff] }
  0x91   :  { %1195 = vmatpush.xpose.msk.msrb.mxu3 %vm185_vm1, %v128_v17  ;;  %v1222_v17 = vld [vmem:[%s1869_s7 + $0x38] sm:$0xff] }
  0x92   :  { %410 = vmatpush.msrb.mxu1 %v1222_v17 }
  0x94   :  { %411 = vmatpush.msrb.mxu1 %v1221_v18 }
  0x95   :  { %1196 = vmatpush.xpose.msk.msrb.mxu3 %vm185_vm1, %v125_v20  ;;  %v1219_v20 = vld [vmem:[%s1869_s7 + $0x20] sm:$0xff] }
  0x96   :  { %v130_v22 = vpop.f32.mrf.mxu1  ;;  %412 = vmatpush.msrb.mxu1 %v1220_v19 }
  0x97   :  { %v131_v26 = vadd.f32 %v1320_v15, %v130_v22  ;;  %v173_v43 = vpop.f32.mrf.mxu2  ;;  %v1250_v22 = vld [vmem:[%s1867_s5 + $0x50] sm:$0xff] }
  0x98   :  { %1197 = vmatmul.msk.f32.vlgmr.msrb.gmra.mxu3 %vm185_vm1, %v82_v21  ;;  %v174_v50 = vadd.f32 %v1322_v46, %v173_v43  ;;  %413 = vmatpush.msrb.mxu1 %v1219_v20  ;;  %v1251_v21 = vld [vmem:[%s1867_s5 + $0x58] sm:$0xff] }
  0x99   :  { %1224 = vmatmul.msk.f32.vlgmr.msrb.gmra.mxu1 %vm57_vm0, %v1547_v32 }
  0x9a   :  { %670 = vmatpush.msra.mxu1 %v1251_v21 }
  0x9c   :  { %671 = vmatpush.msra.mxu1 %v1250_v22 }
  0x9e   :  { %v133_v23 = vpop.f32.mrf.mxu1 }
  0x9f   :  { %v134_v24 = vadd.f32 %v1320_v15, %v133_v23  ;;  %v176_v48 = vpop.f32.mrf.mxu2  ;;  %v1249_v23 = vld [vmem:[%s1867_s5 + $0x48] sm:$0xff] }
  0xa0   :  { %v177_v51 = vadd.f32 %v1322_v46, %v176_v48  ;;  %672 = vmatpush.msra.mxu1 %v1249_v23 }
  0xa1   :  { %1198 = vmatpush.xpose.msk.msra.mxu3 %vm185_vm1, %v134_v24  ;;  %1225 = vmatmul.msk.f32.gmra.mxu1 %vm57_vm0, %v1554_v34  ;;  %v1248_v24 = vld [vmem:[%s1867_s5 + $0x40] sm:$0xff] }
  0xa2   :  { %286 = vmatpush.msrb.mxu0 %v177_v51  ;;  %673 = vmatpush.msra.mxu1 %v1248_v24 }
  0xa4   :  { %287 = vmatpush.msrb.mxu0 %v174_v50  ;;  %v1325_v50 = vld [vmem:[%s1870_s8 + $0x1] ss:$0 sm:$0xff] }
  0xa5   :  { %1199 = vmatpush.xpose.msk.msra.mxu3 %vm185_vm1, %v131_v26  ;;  %v1244_v26 = vld [vmem:[%s1865_s3 + $0x58] sm:$0xff] }
  0xa6   :  { %338 = vmatpush.msra.mxu0 %v1206_v1 }
  0xa7   :  { %v179_v55 = vpop.f32.mrf.mxu2 }
  0xa8   :  { %1200 = vmatmul.msk.f32.vlgmr.msra.gmra.mxu3 %vm185_vm1, %v85_v27  ;;  %v180_v59 = vadd.f32 %v1322_v46, %v179_v55  ;;  %339 = vmatpush.msra.mxu0 %v1205_v2 }
  0xa9   :  { %1226 = vmatmul.msk.f32.gmra.mxu1 %vm57_vm0, %v1561_v37 }
  0xaa   :  { %340 = vmatpush.msra.mxu0 %v1204_v4 }
  0xac   :  { %341 = vmatpush.msra.mxu0 %v1203_v5 }
  0xaf   :  { %v182_v58 = vpop.f32.mrf.mxu2 }
  0xb0   :  { %v183_v60 = vadd.f32 %v1322_v46, %v182_v58 }
  0xb1   :  { %1227 = vmatmul.msk.f32.gmra.mxu1 %vm57_vm0, %v1569_v40 }
  0xb2   :  { %309 = vmatpush.msrb.mxu3 %v183_v60  ;;  %v1326_v60 = vld [vmem:[%s1868_s6 + $0x2] ss:$0 sm:$0xff] }
  0xb4   :  { %310 = vmatpush.msrb.mxu3 %v180_v59 }
  0xb6   :  { %371 = vmatpush.msra.mxu3 %v1213_v61 }
  0xb8   :  { %372 = vmatpush.msra.mxu3 %v1212_v62 }
  0xb9   :  { %1253 = vmatmul.msk.f32.vlgmr.msra.gmra.mxu1 %vm57_vm0, %v1475_v6 }
  0xba   :  { %373 = vmatpush.msra.mxu3 %v1211_v63 }
  0xbc   :  { %374 = vmatpush.msra.mxu3 %v1210_v0  ;;  %v1327_v0 = vld [vmem:[%s1866_s4 + $0x2] ss:$0 sm:$0xff] }
  0xc1   :  { %1254 = vmatmul.msk.f32.gmra.mxu1 %vm57_vm0, %v1502_v11 }
  0xc9   :  { %1255 = vmatmul.msk.f32.gmra.mxu1 %vm57_vm0, %v1509_v12 }
  0xd1   :  { %1256 = vmatmul.msk.f32.gmra.mxu1 %vm57_vm0, %v1516_v13 }
 0x11b   :  { %v212_v33 = vpop.f32.mrf.mxu3 }
 0x11c   :  { %v244_v39 = vmul.f32 0.35355338, %v212_v33  ;;  %v1323_v33 = vld [vmem:[%s1868_s6 + $0x1] ss:$0 sm:$0xff] }
 0x11e   :  { %v247_v41 = vsel %vm246_vm2, %v244_v39, -inf }
 0x12b   :  { %v241_v35 = vpop.f32.mrf.mxu3 }
 0x12c   :  { %v245_v36 = vmul.f32 0.35355338, %v241_v35 }
 0x12e   :  { %v250_v38 = vsel %vm246_vm2, %v245_v36, -inf }
 0x12f   :  { %251 = vmax.xlane.f32.xlu0 %v250_v38  ;;  %v1324_v38 = vld [vmem:[%s1866_s4 + $0x1] ss:$0 sm:$0xff] }
 0x137   :  { %248 = vmax.xlane.f32.xlu0 %v247_v41 }
 0x1a2   :  { %v252_v42 = vpop.xlane.xlu0 %251 }
 0x1a3   :  { %v254_v44 = vsub.f32 %v245_v36, %v252_v42 }
 0x1a5   :  { %v257_v45 = vmul.f32 1.442695, %v254_v44 }
 0x1a7   :  { %1333 = vpow2.f32 %v257_v45 }
 0x1aa   :  { %v249_v47 = vpop.xlane.xlu0 %248 }
 0x1ab   :  { %v253_v49 = vsub.f32 %v244_v39, %v249_v47 }
 0x1ad   :  { %v1334_v52 = vpop.eup %1333  ;;  %v255_v53 = vmul.f32 1.442695, %v253_v49  ;;  %v415_v49 = vpop.f32.mrf.mxu1 }
 0x1ae   :  { %v262_v54 = vsel %vm246_vm2, %v1334_v52, 0.0 }
 0x1af   :  { %1335 = vpow2.f32 %v255_v53  ;;  %263 = vadd.xlane.f32.xlu1 %v262_v54 }
 0x1b5   :  { %v1336_v56 = vpop.eup %1335  ;;  %v418_v51 = vpop.f32.mrf.mxu1 }
 0x1b6   :  { %v259_v57 = vsel %vm246_vm2, %v1336_v56, 0.0  ;;  %v419_v53 = vadd.f32 %v1325_v50, %v418_v51  ;;  %v1236_v51 = vld [vmem:[%s1871_s9 + $0x8] sm:$0xff] }
 0x1b7   :  { %260 = vadd.xlane.f32.xlu1 %v259_v57 }
 0x1bd   :  { %v421_v54 = vpop.f32.mrf.mxu1 }
 0x1be   :  { %v422_v58 = vadd.f32 %v1325_v50, %v421_v54 }
 0x1c5   :  { %v424_v55 = vpop.f32.mrf.mxu1 }
 0x1c6   :  { %v425_v59 = vadd.f32 %v1325_v50, %v424_v55 }
 0x222   :  { %v264_v3 = vpop.xlane.xlu1 %263 }
 0x223   :  { %1337 = vrcp.f32 %v264_v3 }
 0x229   :  { %v1338_v7 = vpop.eup %1337 }
 0x22a   :  { %v268_v8 = vmul.f32 %v1338_v7, %v1334_v52  ;;  %v261_v14 = vpop.xlane.xlu1 %260  ;;  %v416_v52 = vadd.f32 %v1325_v50, %v415_v49 }
 0x22b   :  { %1339 = vrcp.f32 %v261_v14 }
 0x22c   :  { %1202 = vmatmul.msk.f32.vlgmr.msrb.gmra.mxu3 %vm246_vm2, %v268_v8 }
 0x22d   :  { %637 = vmatpush.msrb.mxu3 %v1244_v26 }
 0x22f   :  { %638 = vmatpush.msrb.mxu3 %v1243_v28 }
 0x231   :  { %v1340_v15 = vpop.eup %1339  ;;  %639 = vmatpush.msrb.mxu3 %v1242_v29 }
 0x232   :  { %v267_v16 = vmul.f32 %v1340_v15, %v1336_v56  ;;  %v675_v56 = vpop.f32.mrf.mxu1 }
 0x233   :  { %640 = vmatpush.msrb.mxu3 %v1241_v31  ;;  %v676_v62 = vadd.f32 %v1326_v60, %v675_v56 }
 0x234   :  { %1201 = vmatmul.msk.f32.vlgmr.msrb.gmra.mxu0 %vm246_vm2, %v267_v16  ;;  %1215 = vmatmul.msk.f32.vlgmr.msra.gmra.mxu3 %vm57_vm0, %v1475_v6 }
 0x23a   :  { %v678_v57 = vpop.f32.mrf.mxu1 }
 0x23b   :  { %v679_v63 = vadd.f32 %v1326_v60, %v678_v57 }
 0x23c   :  { %1216 = vmatmul.msk.f32.gmra.mxu3 %vm57_vm0, %v1502_v11  ;;  %1208 = vmatmul.msk.f32.vlgmr.msra.gmra.mxu0 %vm57_vm0, %v1486_v9 }
 0x242   :  { %v681_v61 = vpop.f32.mrf.mxu1 }
 0x243   :  { %v682_v5 = vadd.f32 %v1326_v60, %v681_v61  ;;  %v1287_v61 = vld [vmem:[%s1867_s5 + $0x78] sm:$0xff] }
 0x244   :  { %1217 = vmatmul.msk.f32.gmra.mxu3 %vm57_vm0, %v1509_v12  ;;  %1209 = vmatmul.msk.f32.gmra.mxu0 %vm57_vm0, %v1491_v10 }
 0x245   :  { %942 = vmatpush.msrb.mxu1 %v1287_v61 }
 0x24a   :  { %v684_v3 = vpop.f32.mrf.mxu1 }
 0x24b   :  { %v685_v4 = vadd.f32 %v1326_v60, %v684_v3 }
 0x24c   :  { %1218 = vmatmul.msk.f32.gmra.mxu3 %vm57_vm0, %v1516_v13 }
 0x24d   :  { %1269 = vmatpush.xpose.msk.msra.mxu3 %vm185_vm1, %v685_v4 }
 0x251   :  { %1270 = vmatpush.xpose.msk.msra.mxu3 %vm185_vm1, %v682_v5 }
 0x254   :  { %1246 = vmatmul.msk.f32.vlgmr.msrb.gmra.mxu3 %vm57_vm0, %v1486_v9 }
 0x25c   :  { %1247 = vmatmul.msk.f32.gmra.mxu3 %vm57_vm0, %v1491_v10 }
 0x2af   :  { %v1651_v25 = vpop.f32.mrf.mxu3 }
 0x2b1   :  { %v1664_v30 = vpop.f32.mrf.mxu0 }
 0x2b7   :  { %v376_v27 = vpop.f32.mrf.mxu3 }
 0x2b8   :  { %v377_v41 = vadd.f32 %v1323_v33, %v376_v27 }
 0x2b9   :  { %v343_v39 = vpop.f32.mrf.mxu0 }
 0x2ba   :  { %v344_v42 = vadd.f32 %v1324_v38, %v343_v39 }
 0x2bf   :  { %v379_v35 = vpop.f32.mrf.mxu3 }
 0x2c0   :  { %v380_v36 = vadd.f32 %v1323_v33, %v379_v35 }
 0x2c1   :  { %v346_v46 = vpop.f32.mrf.mxu0 }
 0x2c2   :  { %1228 = vmatpush.xpose.msk.msrb.mxu2 %vm185_vm1, %v380_v36  ;;  %v347_v48 = vadd.f32 %v1324_v38, %v346_v46  ;;  %v315_v38 = vld [vmem:[%s1871_s9] sm:$0xff] }
 0x2c6   :  { %1229 = vmatpush.xpose.msk.msrb.mxu2 %vm185_vm1, %v377_v41 }
 0x2c7   :  { %v382_v43 = vpop.f32.mrf.mxu3 }
 0x2c8   :  { %v383_v47 = vadd.f32 %v1323_v33, %v382_v43 }
 0x2c9   :  { %1230 = vmatmul.msk.f32.vlgmr.msrb.gmra.mxu2 %vm185_vm1, %v344_v42 }
 0x2ca   :  { %526 = vmatpush.msra.mxu2 %v419_v53  ;;  %v1259_v53 = vld [vmem:[%s1869_s7 + $0x50] sm:$0xff] }
 0x2cc   :  { %527 = vmatpush.msra.mxu2 %v416_v52  ;;  %v1260_v52 = vld [vmem:[%s1869_s7 + $0x58] sm:$0xff] }
 0x2ce   :  { %578 = vmatpush.msrb.mxu2 %v1236_v51 }
 0x2cf   :  { %v385_v44 = vpop.f32.mrf.mxu3 }
 0x2d0   :  { %v386_v45 = vadd.f32 %v1323_v33, %v385_v44 }
 0x2d2   :  { %1231 = vmatpush.xpose.msk.msrb.mxu0 %vm185_vm1, %v386_v45 }
 0x2d6   :  { %1232 = vmatpush.xpose.msk.msrb.mxu0 %vm185_vm1, %v383_v47 }
 0x2d7   :  { %v642_v1 = vpop.f32.mrf.mxu3 }
 0x2d8   :  { %v643_v2 = vadd.f32 %v1327_v0, %v642_v1  ;;  %v1284_v1 = vld [vmem:[%s1867_s5 + $0x60] sm:$0xff] }
 0x2d9   :  { %1233 = vmatmul.msk.f32.vlgmr.msrb.gmra.mxu0 %vm185_vm1, %v347_v48 }
 0x2da   :  { %549 = vmatpush.msra.mxu0 %v425_v59 }
 0x2dc   :  { %550 = vmatpush.msra.mxu0 %v422_v58 }
 0x2de   :  { %607 = vmatpush.msrb.mxu0 %v315_v38 }
 0x2df   :  { %v645_v7 = vpop.f32.mrf.mxu3 }
 0x2e0   :  { %v646_v8 = vadd.f32 %v1327_v0, %v645_v7  ;;  %v1285_v0 = vld [vmem:[%s1867_s5 + $0x68] sm:$0xff] }
 0x2e2   :  { %1271 = vmatmul.msk.f32.vlgmr.msra.gmra.mxu3 %vm185_vm1, %v646_v8  ;;  %v1328_v8 = vld [vmem:[%s1870_s8 + $0x2] ss:$0 sm:$0xff] }
 0x34c   :  { %v453_v14 = vpop.f32.mrf.mxu2 }
 0x34d   :  { %v485_v15 = vmul.f32 0.35355338, %v453_v14 }
 0x34f   :  { %v487_v16 = vsel %vm246_vm2, %v485_v15, -inf }
 0x350   :  { %488 = vmax.xlane.f32.xlu2 %v487_v16 }
 0x356   :  { %v482_v17 = vpop.f32.mrf.mxu0 }
 0x357   :  { %v486_v18 = vmul.f32 0.35355338, %v482_v17 }
 0x359   :  { %v490_v19 = vsel %vm246_vm2, %v486_v18, -inf }
 0x35a   :  { %491 = vmax.xlane.f32.xlu2 %v490_v19 }
 0x365   :  { %v781_v28 = vpop.f32.mrf.mxu3 }
 0x366   :  { %v785_v31 = vmul.f32 0.35355338, %v781_v28 }
 0x368   :  { %v789_v33 = vsel %vm246_vm2, %v785_v31, -inf }
 0x369   :  { %790 = vmax.xlane.f32.xlu2 %v789_v33 }
 0x3c3   :  { %v489_v20 = vpop.xlane.xlu2 %488 }
 0x3c4   :  { %v493_v21 = vsub.f32 %v485_v15, %v489_v20 }
 0x3c6   :  { %v495_v22 = vmul.f32 1.442695, %v493_v21 }
 0x3c8   :  { %1341 = vpow2.f32 %v495_v22 }
 0x3cd   :  { %v492_v23 = vpop.xlane.xlu2 %491 }
 0x3ce   :  { %v1342_v24 = vpop.eup %1341  ;;  %v494_v26 = vsub.f32 %v486_v18, %v492_v23  ;;  %v1280_v23 = vld [vmem:[%s1865_s3 + $0x78] sm:$0xff] }
 0x3cf   :  { %v499_v27 = vsel %vm246_vm2, %v1342_v24, 0.0 }
 0x3d0   :  { %v497_v29 = vmul.f32 1.442695, %v494_v26  ;;  %500 = vadd.xlane.f32.xlu0 %v499_v27  ;;  %v1277_v26 = vld [vmem:[%s1865_s3 + $0x60] sm:$0xff] }
 0x3d2   :  { %1343 = vpow2.f32 %v497_v29 }
 0x3d8   :  { %v1344_v35 = vpop.eup %1343 }
 0x3d9   :  { %v502_v36 = vsel %vm246_vm2, %v1344_v35, 0.0 }
 0x3da   :  { %503 = vadd.xlane.f32.xlu1 %v502_v36  ;;  %v1329_v36 = vld [vmem:[%s1868_s6 + $0x3] ss:$0 sm:$0xff] }
 0x3dc   :  { %v791_v41 = vpop.xlane.xlu2 %790 }
 0x3dd   :  { %v793_v42 = vsub.f32 %v785_v31, %v791_v41 }
 0x3df   :  { %v796_v44 = vmul.f32 1.442695, %v793_v42 }
 0x443   :  { %v501_v39 = vpop.xlane.xlu0 %500 }
 0x444   :  { %1345 = vrcp.f32 %v501_v39 }
 0x445   :  { %1347 = vpow2.f32 %v796_v44  ;;  %v1330_v44 = vld [vmem:[%s1866_s4 + $0x3] ss:$0 sm:$0xff] }
 0x44a   :  { %v1346_v43 = vpop.eup %1345 }
 0x44b   :  { %v507_v45 = vmul.f32 %v1346_v43, %v1342_v24  ;;  %v1710_v47 = vpop.eup %1347  ;;  %v1278_v24 = vld [vmem:[%s1865_s3 + $0x68] sm:$0xff] }
 0x44c   :  { %v801_v48 = vsel %vm246_vm2, %v1710_v47, 0.0 }
 0x44d   :  { %1234 = vmatmul.msk.f32.vlgmr.msra.gmra.mxu2 %vm246_vm2, %v507_v45  ;;  %v504_v46 = vpop.xlane.xlu1 %503  ;;  %802 = vadd.xlane.f32.xlu1 %v801_v48 }
 0x44e   :  { %1349 = vrcp.f32 %v504_v46  ;;  %709 = vmatpush.msra.mxu2 %v1260_v52 }
 0x450   :  { %710 = vmatpush.msra.mxu2 %v1259_v53  ;;  %v1296_v53 = vld [vmem:[%s1869_s7 + $0x78] sm:$0xff] }
 0x454   :  { %v1350_v49 = vpop.eup %1349 }
 0x455   :  { %v508_v50 = vmul.f32 %v1350_v49, %v1344_v35 }
 0x457   :  { %1235 = vmatmul.msk.f32.vlgmr.msra.gmra.mxu0 %vm246_vm2, %v508_v50 }
 0x458   :  { %1266 = vmatpush.xpose.msk.msra.mxu0 %vm185_vm1, %v679_v63  ;;  %v1286_v63 = vld [vmem:[%s1867_s5 + $0x70] sm:$0xff] }
 0x459   :  { %943 = vmatpush.msrb.mxu1 %v1286_v63 }
 0x45b   :  { %944 = vmatpush.msrb.mxu1 %v1285_v0 }
 0x45c   :  { %1267 = vmatpush.xpose.msk.msra.mxu0 %vm185_vm1, %v676_v62 }
 0x45d   :  { %945 = vmatpush.msrb.mxu1 %v1284_v1 }
 0x45e   :  { %1289 = vmatmul.msk.f32.vlgmr.msrb.gmra.mxu1 %vm57_vm0, %v1475_v6 }
 0x45f   :  { %1239 = vmatmul.msk.f32.vlgmr.msrb.gmra.mxu0 %vm185_vm1, %v1664_v30  ;;  %v1257_v30 = vld [vmem:[%s1869_s7 + $0x40] sm:$0xff] }
 0x466   :  { %1290 = vmatmul.msk.f32.gmra.mxu1 %vm57_vm0, %v1502_v11 }
 0x467   :  { %1240 = vmatmul.msk.f32.gmra.mxu0 %vm185_vm1, %v1651_v25  ;;  %v1258_v25 = vld [vmem:[%s1869_s7 + $0x48] sm:$0xff] }
 0x468   :  { %711 = vmatpush.msra.mxu2 %v1258_v25  ;;  %v1295_v25 = vld [vmem:[%s1869_s7 + $0x70] sm:$0xff] }
 0x46a   :  { %712 = vmatpush.msra.mxu2 %v1257_v30  ;;  %v1294_v30 = vld [vmem:[%s1869_s7 + $0x68] sm:$0xff] }
 0x46e   :  { %1291 = vmatmul.msk.f32.gmra.mxu1 %vm57_vm0, %v1509_v12 }
 0x46f   :  { %1268 = vmatmul.msk.f32.vlgmr.msra.gmra.mxu0 %vm185_vm1, %v643_v2 }
 0x476   :  { %1292 = vmatmul.msk.f32.gmra.mxu1 %vm57_vm0, %v1516_v13  ;;  %v1279_v13 = vld [vmem:[%s1865_s3 + $0x70] sm:$0xff] }
 0x4c0   :  { %v803_v11 = vpop.xlane.xlu1 %802 }
 0x4d0   :  { %v529_v54 = vpop.f32.mrf.mxu2 }
 0x4d1   :  { %1237 = vmatmul.msk.f32.vlgmr.msrb.gmra.mxu2 %vm185_vm1, %v529_v54  ;;  %v1293_v54 = vld [vmem:[%s1869_s7 + $0x60] sm:$0xff] }
 0x4d2   :  { %981 = vmatpush.msrb.mxu2 %v1296_v53 }
 0x4d4   :  { %v552_v55 = vpop.f32.mrf.mxu0  ;;  %982 = vmatpush.msrb.mxu2 %v1295_v25 }
 0x4d6   :  { %983 = vmatpush.msrb.mxu2 %v1294_v30 }
 0x4d8   :  { %984 = vmatpush.msrb.mxu2 %v1293_v54 }
 0x4d9   :  { %1238 = vmatmul.msk.f32.gmra.mxu2 %vm185_vm1, %v552_v55 }
 0x4db   :  { %v947_v27 = vpop.f32.mrf.mxu1 }
 0x4dc   :  { %v1739_v56 = vpop.f32.mrf.mxu0  ;;  %v948_v42 = vadd.f32 %v1329_v36, %v947_v27  ;;  %v1332_v27 = vld [vmem:[%s1872_s10] ss:$0 sm:$0xff]  ;;  %s1393_s10 = smov 8  }
 0x4e1   :  { %1262 = vmatmul.msk.f32.vlgmr.msra.gmra.mxu2 %vm57_vm0, %v1547_v32 }
 0x4e3   :  { %v950_v28 = vpop.f32.mrf.mxu1 }
 0x4e4   :  { %v1743_v57 = vpop.f32.mrf.mxu0 }
 0x4e9   :  { %1263 = vmatmul.msk.f32.gmra.mxu2 %vm57_vm0, %v1554_v34 }
 0x4eb   :  { %v953_v31 = vpop.f32.mrf.mxu1 }
 0x4ec   :  { %v752_v58 = vpop.f32.mrf.mxu0  ;;  %v954_v41 = vadd.f32 %v1329_v36, %v953_v31 }
 0x4ed   :  { %v784_v59 = vmul.f32 0.35355338, %v752_v58 }
 0x4ef   :  { %v786_v60 = vsel %vm246_vm2, %v784_v59, -inf }
 0x4f0   :  { %787 = vmax.xlane.f32.xlu0 %v786_v60 }
 0x4f1   :  { %1264 = vmatmul.msk.f32.gmra.mxu2 %vm57_vm0, %v1561_v37 }
 0x4f3   :  { %v956_v38 = vpop.f32.mrf.mxu1 }
 0x4f4   :  { %v957_v39 = vadd.f32 %v1329_v36, %v956_v38 }
 0x4f9   :  { %1265 = vmatmul.msk.f32.gmra.mxu2 %vm57_vm0, %v1569_v40 }
 0x501   :  { %1298 = vmatmul.msk.f32.vlgmr.msrb.gmra.mxu2 %vm57_vm0, %v1547_v32 }
 0x509   :  { %1299 = vmatmul.msk.f32.gmra.mxu2 %vm57_vm0, %v1554_v34 }
 0x511   :  { %1300 = vmatmul.msk.f32.gmra.mxu2 %vm57_vm0, %v1561_v37 }
 0x519   :  { %1301 = vmatmul.msk.f32.gmra.mxu2 %vm57_vm0, %v1569_v40 }
 0x554   :  { %v1755_v62 = vpop.f32.mrf.mxu2 }
 0x555   :  { %v610_v55 = vadd.f32 %v1739_v56, %v1755_v62 }
 0x55c   :  { %v1768_v2 = vpop.f32.mrf.mxu2 }
 0x55d   :  { %v613_v60 = vadd.f32 %v1743_v57, %v1768_v2  ;;  %v1331_v57 = vld [vmem:[%s1870_s8 + $0x3] ss:$0 sm:$0xff] }
 0x563   :  { %v788_v3 = vpop.xlane.xlu0 %787 }
 0x564   :  { %v792_v4 = vsub.f32 %v784_v59, %v788_v3  ;;  %v714_v5 = vpop.f32.mrf.mxu2 }
 0x565   :  { %v715_v15 = vadd.f32 %v1328_v8, %v714_v5 }
 0x566   :  { %v794_v7 = vmul.f32 1.442695, %v792_v4 }
 0x568   :  { %1351 = vpow2.f32 %v794_v7 }
 0x569   :  { %1353 = vrcp.f32 %v803_v11 }
 0x56c   :  { %v717_v14 = vpop.f32.mrf.mxu2 }
 0x56d   :  { %v718_v6 = vadd.f32 %v1328_v8, %v717_v14 }
 0x56e   :  { %v1352_v16 = vpop.eup %1351 }
 0x56f   :  { %v798_v17 = vsel %vm246_vm2, %v1352_v16, 0.0  ;;  %825 = vmatpush.msrb.mxu0 %v718_v6  ;;  %v1354_v19 = vpop.eup %1353 }
 0x570   :  { %799 = vadd.xlane.f32.xlu2 %v798_v17  ;;  %v807_v22 = vmul.f32 %v1354_v19, %v1710_v47 }
 0x571   :  { %826 = vmatpush.msrb.mxu0 %v715_v15 }
 0x574   :  { %v720_v18 = vpop.f32.mrf.mxu2 }
 0x575   :  { %v721_v20 = vadd.f32 %v1328_v8, %v720_v18 }
 0x57c   :  { %v723_v12 = vpop.f32.mrf.mxu2 }
 0x57d   :  { %v724_v21 = vadd.f32 %v1328_v8, %v723_v12 }
 0x57f   :  { %848 = vmatpush.msrb.mxu3 %v724_v21 }
 0x581   :  { %849 = vmatpush.msrb.mxu3 %v721_v20 }
 0x582   :  { %1273 = vmatmul.msk.f32.vlgmr.msrb.gmra.mxu3 %vm246_vm2, %v807_v22 }
 0x583   :  { %909 = vmatpush.msra.mxu3 %v1280_v23 }
 0x584   :  { %v986_v4 = vpop.f32.mrf.mxu2 }
 0x585   :  { %910 = vmatpush.msra.mxu3 %v1279_v13  ;;  %v987_v40 = vadd.f32 %v1331_v57, %v986_v4  ;;  %v1310_v13 = vld [vmem:[%s1871_s9 + $0x18] sm:$0xff] }
 0x587   :  { %911 = vmatpush.msra.mxu3 %v1278_v24 }
 0x589   :  { %912 = vmatpush.msra.mxu3 %v1277_v26 }
 0x58a   :  { %1282 = vmatmul.msk.f32.vlgmr.msra.gmra.mxu3 %vm57_vm0, %v1486_v9  ;;  %v951_v9 = vadd.f32 %v1329_v36, %v950_v28 }
 0x58b   :  { %1305 = vmatpush.xpose.msk.msrb.mxu3 %vm185_vm1, %v957_v39 }
 0x58c   :  { %v989_v2 = vpop.f32.mrf.mxu2 }
 0x58d   :  { %v990_v5 = vadd.f32 %v1331_v57, %v989_v2 }
 0x58f   :  { %1306 = vmatpush.xpose.msk.msrb.mxu3 %vm185_vm1, %v954_v41 }
 0x592   :  { %1283 = vmatmul.msk.f32.gmra.mxu3 %vm57_vm0, %v1491_v10  ;;  %v1274_v10 = vld [vmem:[%s1871_s9 + $0x10] sm:$0xff] }
 0x593   :  { %877 = vmatpush.msra.mxu0 %v1274_v10 }
 0x594   :  { %v992_v7 = vpop.f32.mrf.mxu2 }
 0x59c   :  { %v995_v6 = vpop.f32.mrf.mxu2 }
 0x59d   :  { %v996_v17 = vadd.f32 %v1331_v57, %v995_v6 }
 0x59f   :  { %1120 = vmatpush.msra.mxu3 %v996_v17 }
 0x5e3   :  { %v800_v29 = vpop.xlane.xlu2 %799 }
 0x5e4   :  { %1355 = vrcp.f32 %v800_v29 }
 0x5ea   :  { %v1356_v33 = vpop.eup %1355 }
 0x5eb   :  { %v806_v35 = vmul.f32 %v1356_v33, %v1352_v16  ;;  %v993_v16 = vadd.f32 %v1331_v57, %v992_v7 }
 0x5ed   :  { %1272 = vmatmul.msk.f32.vlgmr.msrb.gmra.mxu0 %vm246_vm2, %v806_v35  ;;  %1121 = vmatpush.msra.mxu3 %v993_v16 }
 0x5ee   :  { %1302 = vmatpush.xpose.msk.msrb.mxu0 %vm185_vm1, %v951_v9 }
 0x5f2   :  { %1303 = vmatpush.xpose.msk.msrb.mxu0 %vm185_vm1, %v948_v42 }
 0x605   :  { %v851_v43 = vpop.f32.mrf.mxu3 }
 0x60d   :  { %v914_v45 = vpop.f32.mrf.mxu3 }
 0x60e   :  { %v915_v46 = vadd.f32 %v1330_v44, %v914_v45 }
 0x615   :  { %v917_v47 = vpop.f32.mrf.mxu3 }
 0x616   :  { %v918_v48 = vadd.f32 %v1330_v44, %v917_v47 }
 0x618   :  { %1307 = vmatmul.msk.f32.vlgmr.msrb.gmra.mxu3 %vm185_vm1, %v918_v48 }
 0x66a   :  { %v828_v49 = vpop.f32.mrf.mxu0 }
 0x66b   :  { %1275 = vmatmul.msk.f32.vlgmr.msra.gmra.mxu0 %vm185_vm1, %v828_v49 }
 0x66c   :  { %1097 = vmatpush.msra.mxu0 %v990_v5 }
 0x66e   :  { %1098 = vmatpush.msra.mxu0 %v987_v40 }
 0x673   :  { %1276 = vmatmul.msk.f32.gmra.mxu0 %vm185_vm1, %v851_v43 }
 0x67b   :  { %1304 = vmatmul.msk.f32.vlgmr.msrb.gmra.mxu0 %vm185_vm1, %v915_v46 }
 0x67c   :  { %1149 = vmatpush.msrb.mxu0 %v1310_v13 }
 0x69b   :  { %v1053_v50 = vpop.f32.mrf.mxu3 }
 0x69c   :  { %v1057_v51 = vmul.f32 0.35355338, %v1053_v50 }
 0x69e   :  { %v1061_v52 = vsel %vm246_vm2, %v1057_v51, -inf }
 0x69f   :  { %1062 = vmax.xlane.f32.xlu1 %v1061_v52 }
 0x6e8   :  { %v879_v58 = vpop.f32.mrf.mxu0 }
 0x6e9   :  { %v885_v59 = vadd.f32 %v879_v58, %v610_v55 }
 0x6f0   :  { %v882_v61 = vpop.f32.mrf.mxu0 }
 0x6f1   :  { %v886_v63 = vadd.f32 %v882_v61, %v613_v60 }
 0x6f8   :  { %v1024_v32 = vpop.f32.mrf.mxu0 }
 0x6f9   :  { %v1056_v0 = vmul.f32 0.35355338, %v1024_v32 }
 0x6fb   :  { %v1058_v34 = vsel %vm246_vm2, %v1056_v0, -inf }
 0x6fc   :  { %1059 = vmax.xlane.f32.xlu0 %v1058_v34 }
 0x712   :  { %v1063_v1 = vpop.xlane.xlu1 %1062 }
 0x713   :  { %v1065_v56 = vsub.f32 %v1057_v51, %v1063_v1 }
 0x715   :  { %v1068_v62 = vmul.f32 1.442695, %v1065_v56 }
 0x717   :  { %1357 = vpow2.f32 %v1068_v62 }
 0x71d   :  { %v1358_v3 = vpop.eup %1357 }
 0x71e   :  { %v1073_v37 = vsel %vm246_vm2, %v1358_v3, 0.0 }
 0x71f   :  { %1074 = vadd.xlane.f32.xlu0 %v1073_v37 }
 0x76f   :  { %v1060_v8 = vpop.xlane.xlu0 %1059 }
 0x770   :  { %v1064_v14 = vsub.f32 %v1056_v0, %v1060_v8 }
 0x772   :  { %v1066_v15 = vmul.f32 1.442695, %v1064_v14 }
 0x774   :  { %1359 = vpow2.f32 %v1066_v15 }
 0x77a   :  { %v1360_v11 = vpop.eup %1359 }
 0x77b   :  { %v1070_v18 = vsel %vm246_vm2, %v1360_v11, 0.0 }
 0x77c   :  { %1071 = vadd.xlane.f32.xlu2 %v1070_v18 }
 0x792   :  { %v1075_v12 = vpop.xlane.xlu0 %1074 }
 0x793   :  { %1361 = vrcp.f32 %v1075_v12 }
 0x799   :  { %v1362_v19 = vpop.eup %1361 }
 0x79a   :  { %v1079_v20 = vmul.f32 %v1362_v19, %v1358_v3 }
 0x79c   :  { %1309 = vmatmul.msk.f32.vlgmr.msra.gmra.mxu3 %vm246_vm2, %v1079_v20 }
 0x7ef   :  { %v1072_v21 = vpop.xlane.xlu2 %1071 }
 0x7f0   :  { %1363 = vrcp.f32 %v1072_v21 }
 0x7f6   :  { %v1364_v22 = vpop.eup %1363 }
 0x7f7   :  { %v1078_v23 = vmul.f32 %v1364_v22, %v1360_v11 }
 0x7f9   :  { %1308 = vmatmul.msk.f32.vlgmr.msra.gmra.mxu0 %vm246_vm2, %v1078_v23 }
 0x81f   :  { %v1123_v26 = vpop.f32.mrf.mxu3 }
 0x876   :  { %v1100_v24 = vpop.f32.mrf.mxu0 }
 0x877   :  { %1311 = vmatmul.msk.f32.vlgmr.msrb.gmra.mxu0 %vm185_vm1, %v1100_v24 }
 0x87f   :  { %1312 = vmatmul.msk.f32.gmra.mxu0 %vm185_vm1, %v1123_v26 }
 0x8f4   :  { %v1151_v28 = vpop.f32.mrf.mxu0 }
 0x8f5   :  { %v1157_v29 = vadd.f32 %v1151_v28, %v885_v59 }
 0x8f7   :  { %v1163_v31 = vadd.f32 %v1332_v27, %v1157_v29 }
 0x8f9   :  { %1165 = vst.msk [vmem:[#allocation2] sm:$0xff] %vm57_vm0, %v1163_v31 }
 0x8fc   :  { %v1154_v33 = vpop.f32.mrf.mxu0 }
 0x8fd   :  { %v1158_v35 = vadd.f32 %v1154_v33, %v886_v63 }
 0x8ff   :  { %v1164_v36 = vadd.f32 %v1332_v27, %v1158_v35 }
 0x901   :  { %1166 = vst.msk [vmem:[#allocation2 + $0x8] sm:$0xff] %vm57_vm0, %v1164_v36 }
 0x902   :  { %1179 = dma.vmem_to_hbm [thread:$0]  %s1172_s30, 256, %s1174_s13, [#allocation3], %s1392_s14, %s1392_s14, %s1393_s10  }
 0x903   :  { %1389 = dma.done.wait [#allocation3], 256  }
 0x904   :  { %1390 = vsyncadd [#allocation3], 4294967040 }
 0x905   :  { %1184 = vsyncpa [#allocation3], 1 }

</bundles_post_ra>
